<compile_context>
chip_gen: v6e
topology: v6e:2x2x1
jax: 0.10.0
libtpu: 0.0.40
codegen_flags: <defaults>
</compile_context>

<pallas_src>
import jax
import jax.numpy as jnp
from jax.experimental import pallas as pl
from jax.experimental.pallas import tpu as pltpu


def _round_up(x, m):
    return ((x + m - 1) // m) * m


def _pad_to(a, shape):
    pads = [(0, t - s) for s, t in zip(a.shape, shape)]
    if all(p == (0, 0) for p in pads):
        return a
    return jnp.pad(a, pads)


# ----------------------------- kernels -----------------------------

def _shared_matmul_kernel(x_ref, w_ref, b_ref, o_ref, acc_ref):
    # grid = (M_tiles, N_tiles, K_tiles); K is last ("arbitrary").
    # x_ref: (tm, tk)  w_ref: (tk, tn)  b_ref: (1, tn) f32
    # o_ref: (tm, tn)  acc_ref: (tm, tn) f32
    k = pl.program_id(2)

    @pl.when(k == 0)
    def _():
        acc_ref[...] = jnp.zeros_like(acc_ref)

    acc_ref[...] += jnp.dot(x_ref[...], w_ref[...],
                            preferred_element_type=jnp.float32)

    @pl.when(k == pl.num_programs(2) - 1)
    def _():
        # Bias add + cast in f32 epilogue only on the final K step.
        o_ref[...] = (acc_ref[...] + b_ref[...]).astype(o_ref.dtype)


def _individual_matmul_kernel(x_ref, w_ref, b_ref, o_ref, acc_ref):
    # grid = (n_vars, M_tiles, N_tiles, K_tiles); K is last ("arbitrary").
    # x_ref: (1, tm, tk)  w_ref: (1, tk, tn)  b_ref: (1, 1, tn) f32
    # o_ref: (1, tm, tn)  acc_ref: (tm, tn) f32
    k = pl.program_id(3)

    @pl.when(k == 0)
    def _():
        acc_ref[...] = jnp.zeros_like(acc_ref)

    acc_ref[...] += jnp.dot(x_ref[0], w_ref[0],
                            preferred_element_type=jnp.float32)

    @pl.when(k == pl.num_programs(3) - 1)
    def _():
        o_ref[0] = (acc_ref[...] + b_ref[0]).astype(o_ref.dtype)


# ----------------------------- wrapper -----------------------------

def flatten_head_forward(x, weight, bias, *, individual, compute_dtype=None,
                         tm=256, tn=256, tk=512):
    """Pallas implementation of Flatten_Head.forward (eval mode).

    x:      (B, n_vars, d_model, patch_num)
    weight: (n_vars, nf, target_window) if individual else (1, nf, target_window)
            (stored pre-transposed vs. torch's (target_window, nf) convention)
    bias:   (n_vars, target_window)     if individual else (1, target_window)
    compute_dtype: dtype for the MXU operands (e.g. jnp.bfloat16 to halve HBM
            traffic).  Accumulation and bias epilogue are always float32.

    returns (B, n_vars, target_window), dtype == x.dtype
    """
    B, n_vars, d_model, patch_num = x.shape
    nf = d_model * patch_num
    T = weight.shape[-1]
    out_dtype = x.dtype
    cdt = x.dtype if compute_dtype is None else compute_dtype

    # nn.Flatten(start_dim=-2): contiguous reshape, free.
    x_flat = x.reshape(B, n_vars, nf)

    if not individual:
        # --- One big GEMM: (B*n_vars, nf) @ (nf, T); no transposes. ---
        M = B * n_vars
        x2 = x_flat.reshape(M, nf)
        w2 = weight.reshape(nf, T)
        b2 = bias.reshape(1, T)

        tm_ = min(tm, _round_up(M, 8))
        tn_ = min(tn, _round_up(T, 128))      # lane-dense output tiles
        tk_ = min(tk, _round_up(nf, 128))
        Mp, Tp, Kp = _round_up(M, tm_), _round_up(T, tn_), _round_up(nf, tk_)

        x2 = _pad_to(x2, (Mp, Kp)).astype(cdt)
        w2 = _pad_to(w2, (Kp, Tp)).astype(cdt)
        b2 = _pad_to(b2, (1, Tp)).astype(jnp.float32)

        out = pl.pallas_call(
            _shared_matmul_kernel,
            out_shape=jax.ShapeDtypeStruct((Mp, Tp), out_dtype),
            grid_spec=pltpu.PrefetchScalarGridSpec(
                num_scalar_prefetch=0,
                grid=(Mp // tm_, Tp // tn_, Kp // tk_),
                in_specs=[
                    pl.BlockSpec((tm_, tk_), lambda m, n, k: (m, k)),
                    pl.BlockSpec((tk_, tn_), lambda m, n, k: (k, n)),
                    pl.BlockSpec((1, tn_), lambda m, n, k: (0, n)),
                ],
                out_specs=pl.BlockSpec((tm_, tn_), lambda m, n, k: (m, n)),
                scratch_shapes=[pltpu.VMEM((tm_, tn_), jnp.float32)],
            ),
            compiler_params=pltpu.CompilerParams(
                dimension_semantics=("parallel", "parallel", "arbitrary")),
        )(x2, w2, b2)

        return out[:M, :T].reshape(B, n_vars, T)

    # --- individual=True: per-variable Linear; grid over (var, M, N, K). ---
    # Var-major layout so the last two block dims tile cleanly; the output
    # transpose back to (B, n_vars, T) could be elided if the consumer accepts
    # var-major layout (kept here to preserve module semantics).
    x_vm = jnp.transpose(x_flat, (1, 0, 2))          # (n_vars, B, nf)

    M = B
    tm_ = min(tm, _round_up(M, 8))
    tn_ = min(tn, _round_up(T, 128))
    tk_ = min(tk, _round_up(nf, 128))
    Mp, Tp, Kp = _round_up(M, tm_), _round_up(T, tn_), _round_up(nf, tk_)

    x_p = _pad_to(x_vm, (n_vars, Mp, Kp)).astype(cdt)
    w_p = _pad_to(weight, (n_vars, Kp, Tp)).astype(cdt)
    b_p = _pad_to(bias[:, None, :], (n_vars, 1, Tp)).astype(jnp.float32)

    out_vm = pl.pallas_call(
        _individual_matmul_kernel,
        out_shape=jax.ShapeDtypeStruct((n_vars, Mp, Tp), out_dtype),
        grid_spec=pltpu.PrefetchScalarGridSpec(
            num_scalar_prefetch=0,
            grid=(n_vars, Mp // tm_, Tp // tn_, Kp // tk_),
            in_specs=[
                pl.BlockSpec((1, tm_, tk_), lambda v, m, n, k: (v, m, k)),
                pl.BlockSpec((1, tk_, tn_), lambda v, m, n, k: (v, k, n)),
                pl.BlockSpec((1, 1, tn_), lambda v, m, n, k: (v, 0, n)),
            ],
            out_specs=pl.BlockSpec((1, tm_, tn_), lambda v, m, n, k: (v, m, n)),
            scratch_shapes=[pltpu.VMEM((tm_, tn_), jnp.float32)],
        ),
        compiler_params=pltpu.CompilerParams(
            dimension_semantics=("parallel", "parallel", "parallel",
                                 "arbitrary")),
    )(x_p, w_p, b_p)

    return jnp.transpose(out_vm[:, :M, :T], (1, 0, 2))  # (B, n_vars, T)


# ----------------------------- reference -----------------------------

def _reference(x, weight, bias, *, individual):
    B, n_vars, d_model, patch_num = x.shape
    nf = d_model * patch_num
    x_flat = x.reshape(B, n_vars, nf)
    if individual:
        return jnp.einsum('bvk,vkt->bvt', x_flat, weight) + bias[None, :, :]
    return x_flat @ weight[0] + bias[0]


if __name__ == "__main__":
    # Small shapes consistent with the module:
    # x: [batch, n_vars, d_model, patch_num]; nf = d_model * patch_num.
    B, n_vars, d_model, patch_num = 2, 4, 16, 16
    nf = d_model * patch_num        # 256
    target_window = 96              # deliberately not a multiple of 128

    key = jax.random.PRNGKey(0)
    kx, kw, kb = jax.random.split(key, 3)

    x = jax.random.normal(kx, (B, n_vars, d_model, patch_num), dtype=jnp.float32)
    # Per-variable Linear params (torch Linear: y = x @ W.T + b); we store W
    # pre-transposed as (n_heads, nf, target_window).
    weight = 0.05 * jax.random.normal(kw, (n_vars, nf, target_window),
                                      dtype=jnp.float32)
    bias = 0.05 * jax.random.normal(kb, (n_vars, target_window),
                                    dtype=jnp.float32)

    # --- individual=True, f32 compute ---
    out_i = jax.block_until_ready(
        flatten_head_forward(x, weight, bias, individual=True))
    ref_i = _reference(x, weight, bias, individual=True)
    assert out_i.shape == (B, n_vars, target_window), out_i.shape
    assert jnp.allclose(out_i, ref_i, atol=1e-4, rtol=1e-4), "mismatch (indiv)"

    # --- individual=False (shared head), f32 compute ---
    w_shared, b_shared = weight[:1], bias[:1]
    out_s = jax.block_until_ready(
        flatten_head_forward(x, w_shared, b_shared, individual=False))
    ref_s = _reference(x, w_shared, b_shared, individual=False)
    assert out_s.shape == (B, n_vars, target_window), out_s.shape
    assert jnp.allclose(out_s, ref_s, atol=1e-4, rtol=1e-4), "mismatch (shared)"

    # --- bf16 compute path (bandwidth optimization), looser tolerance ---
    out_bf = jax.block_until_ready(
        flatten_head_forward(x, w_shared, b_shared, individual=False,
                             compute_dtype=jnp.bfloat16))
    assert jnp.allclose(out_bf, ref_s, atol=5e-2, rtol=5e-2), "mismatch (bf16)"

    print("KERNEL_OK")
</pallas_src>

<mosaic_0001>
module attributes {stable_mosaic.version = 11 : i64} {
  func.func @_individual_matmul_kernel(%arg0: i32, %arg1: i32, %arg2: i32, %arg3: i32, %arg4: memref<1x8x256xf32, #tpu.memory_space<vmem>>, %arg5: memref<1x256x128xf32, #tpu.memory_space<vmem>>, %arg6: memref<1x1x128xf32, #tpu.memory_space<vmem>>, %arg7: memref<1x8x128xf32, #tpu.memory_space<vmem>>, %arg8: memref<8x128xf32, #tpu.memory_space<vmem>>) attributes {dimension_semantics = [#tpu.dimension_semantics<parallel>, #tpu.dimension_semantics<parallel>, #tpu.dimension_semantics<parallel>, #tpu.dimension_semantics<arbitrary>], iteration_bounds = array<i64: 4, 1, 1, 1>, scalar_prefetch = 0 : i64, scratch_operands = 1 : i64, tpu.core_type = #tpu.core_type<tc>, window_params = [{transform_indices = @transform_0, window_bounds = array<i64: 1, 8, 256>}, {transform_indices = @transform_1, window_bounds = array<i64: 1, 256, 128>}, {transform_indices = @transform_2, window_bounds = array<i64: 1, 1, 128>}, {transform_indices = @transform_3, window_bounds = array<i64: 1, 8, 128>}]} {
    %c0_i32 = arith.constant 0 : i32
    %0 = arith.cmpi eq, %arg3, %c0_i32 : i32
    %1 = arith.extui %0 : i1 to i32
    %c0_i32_0 = arith.constant 0 : i32
    %2 = arith.cmpi ne, %1, %c0_i32_0 : i32
    scf.if %2 {
      %cst_12 = arith.constant 0.000000e+00 : f32
      %14 = vector.broadcast %cst_12 : f32 to vector<8x128xf32>
      %c0_13 = arith.constant 0 : index
      %c0_14 = arith.constant 0 : index
      %15 = vector.load %arg8[%c0_13, %c0_14] : memref<8x128xf32, #tpu.memory_space<vmem>>, vector<8x128xf32>
      tpu.vector_store %arg8[%c0_13, %c0_14], %14 {strides = array<i32>} : memref<8x128xf32, #tpu.memory_space<vmem>>, vector<8x128xf32>,
    } else {
    }
    %c0 = arith.constant 0 : index
    %c0_1 = arith.constant 0 : index
    %3 = vector.load %arg8[%c0, %c0_1] : memref<8x128xf32, #tpu.memory_space<vmem>>, vector<8x128xf32>
    %c0_2 = arith.constant 0 : index
    %c0_3 = arith.constant 0 : index
    %c0_4 = arith.constant 0 : index
    %4 = vector.load %arg4[%c0_2, %c0_3, %c0_4] : memref<1x8x256xf32, #tpu.memory_space<vmem>>, vector<1x8x256xf32>
    %5 = vector.shape_cast %4 : vector<1x8x256xf32> to vector<8x256xf32>
    %c0_5 = arith.constant 0 : index
    %c0_6 = arith.constant 0 : index
    %c0_7 = arith.constant 0 : index
    %6 = vector.load %arg5[%c0_5, %c0_6, %c0_7] : memref<1x256x128xf32, #tpu.memory_space<vmem>>, vector<1x256x128xf32>
    %7 = vector.shape_cast %6 : vector<1x256x128xf32> to vector<256x128xf32>
    %cst = arith.constant dense<0.000000e+00> : vector<8x128xf32>
    %8 = tpu.matmul %5, %7, %cst {dimension_numbers = #tpu.dot_dimension_numbers<[1], [0], [0], [1], [0, 0, 1, 1], [], []>} : vector<8x256xf32>, vector<256x128xf32>, vector<8x128xf32> -> vector<8x128xf32>
    %9 = arith.addf %3, %8 : vector<8x128xf32>
    %c0_8 = arith.constant 0 : index
    %c0_9 = arith.constant 0 : index
    %10 = vector.load %arg8[%c0_8, %c0_9] : memref<8x128xf32, #tpu.memory_space<vmem>>, vector<8x128xf32>
    tpu.vector_store %arg8[%c0_8, %c0_9], %9 {strides = array<i32>} : memref<8x128xf32, #tpu.memory_space<vmem>>, vector<8x128xf32>,
    %c0_i32_10 = arith.constant 0 : i32
    %11 = arith.cmpi eq, %arg3, %c0_i32_10 : i32
    %12 = arith.extui %11 : i1 to i32
    %c0_i32_11 = arith.constant 0 : i32
    %13 = arith.cmpi ne, %12, %c0_i32_11 : i32
    scf.if %13 {
      %c0_12 = arith.constant 0 : index
      %c0_13 = arith.constant 0 : index
      %14 = vector.load %arg8[%c0_12, %c0_13] : memref<8x128xf32, #tpu.memory_space<vmem>>, vector<8x128xf32>
      %c0_14 = arith.constant 0 : index
      %c0_15 = arith.constant 0 : index
      %c0_16 = arith.constant 0 : index
      %15 = vector.load %arg6[%c0_14, %c0_15, %c0_16] : memref<1x1x128xf32, #tpu.memory_space<vmem>>, vector<1x1x128xf32>
      %16 = vector.shape_cast %15 : vector<1x1x128xf32> to vector<1x128xf32>
      %17 = vector.broadcast %16 : vector<1x128xf32> to vector<8x128xf32>
      %18 = arith.addf %14, %17 : vector<8x128xf32>
      %c0_17 = arith.constant 0 : index
      %c0_18 = arith.constant 0 : index
      %c0_19 = arith.constant 0 : index
      %19 = vector.load %arg7[%c0_17, %c0_18, %c0_19] : memref<1x8x128xf32, #tpu.memory_space<vmem>>, vector<1x8x128xf32>
      %20 = vector.shape_cast %19 : vector<1x8x128xf32> to vector<8x128xf32>
      %21 = vector.shape_cast %18 : vector<8x128xf32> to vector<1x8x128xf32>
      tpu.vector_store %arg7[%c0_17, %c0_18, %c0_19], %21 {strides = array<i32>} : memref<1x8x128xf32, #tpu.memory_space<vmem>>, vector<1x8x128xf32>,
    } else {
    }
    return
  }
  func.func @transform_0(%arg0: i32, %arg1: i32, %arg2: i32, %arg3: i32) -> (i32, i32, i32) {
    %c0_i32 = arith.constant 0 : i32
    return %arg0, %arg1, %arg3 : i32, i32, i32
  }
  func.func @transform_1(%arg0: i32, %arg1: i32, %arg2: i32, %arg3: i32) -> (i32, i32, i32) {
    %c0_i32 = arith.constant 0 : i32
    return %arg0, %arg3, %arg2 : i32, i32, i32
  }
  func.func @transform_2(%arg0: i32, %arg1: i32, %arg2: i32, %arg3: i32) -> (i32, i32, i32) {
    %c0_i32 = arith.constant 0 : i32
    %c0_i32_0 = arith.constant 0 : i32
    return %arg0, %c0_i32, %arg2 : i32, i32, i32
  }
  func.func @transform_3(%arg0: i32, %arg1: i32, %arg2: i32, %arg3: i32) -> (i32, i32, i32) {
    %c0_i32 = arith.constant 0 : i32
    return %arg0, %arg1, %arg2 : i32, i32, i32
  }
}

</mosaic_0001>

<bundles_post_ra>
// kernel: tpu_custom_call.1
= control target key start
LH: loop header
LB: loop body
LE: loop exit
PB: predicated region body
PF: predicated region fallthrough
CT: control target
= control target key end

     0   :  { %s1128_s0 = inlined_call_operand.hbm [shape: f32[4,8,256], index: 0, kind: input, shape index: {}]   ;;  %s1129_s1 = inlined_call_operand.hbm [shape: f32[4,256,128], index: 1, kind: input, shape index: {}]   ;;  %s1130_s2 = inlined_call_operand.hbm [shape: f32[4,1,128], index: 2, kind: input, shape index: {}]   ;;  %s1131_s3 = inlined_call_operand.hbm [shape: f32[4,8,128], index: 3, kind: output, shape index: {}]  }
   0x1   :  { %1133 = sst [smem:[#allocation15_spill]] %s1129_s1 }
   0x2   :  { %8 = vsyncpa [#allocation4], 0 }
   0x3   :  { %10 = vsyncpa [#allocation4 + $0x1], 0 }
   0x4   :  { %11 = vsyncpa [#allocation7], 0 }
   0x5   :  { %13 = vsyncpa [#allocation7 + $0x1], 0 }
   0x6   :  { %14 = vsyncpa [#allocation5], 0 }
   0x7   :  { %16 = vsyncpa [#allocation5 + $0x1], 0  ;;  %s912_s12 = smov 0   ;;  %s914_s13 = smov 0  }
   0x8   :  { %s916_s14 = smov 0   ;;  %s918_s15 = smov 0  }
   0x9   :  { %s920_s16 = smov 0   ;;  %s922_s17 = smov 0  }
   0xa LB: > { %s943_s18 = sadd.s32 4294967295, %s884_s17   ;;  %s586_s19 = sadd.s32 4294967294, %s884_s17   ;;  %s884_s17 = sphi %s922_s17, %s22_s17   ;;  %s880_s16 = sphi %s920_s16, %s1149_s16   ;;  %s876_s15 = sphi %s918_s15, %s1148_s15   ;;  %s872_s14 = sphi %s916_s14, %s1147_s14   ;;  %s868_s13 = sphi %s914_s13, %s1146_s13   ;;  %s864_s12 = sphi %s912_s12, %s1145_s12  }
   0xb   : > { %s48_s20 = sadd.s32 1, %s880_s16  ;;  %s59_s21 = sadd.s32 1, %s872_s14 }
   0xc   : > { %p50_p0 = scmp.ge.s32.totalorder %s48_s20, 4  ;;  %p66_p1 = scmp.ne.s32.totalorder %s872_s14, %s868_s13 }
   0xd   : > { %p67_p2 = scmp.eq.s32.totalorder %s884_s17, 0  ;;  %p72_p3 = scmp.ne.s32.totalorder %s868_s13, %s864_s12 }
   0xe   : > { %s1151_s20 = smov (%p50_p0, %s48_s20), 0  ;;  %p73_p5 = scmp.eq.s32.totalorder %s943_s18, 0 }
   0xf   : > { %1134 = sst [smem:[#allocation13_spill]] %s1151_s20  ;;  %p955_p4 = por %p67_p2, %p66_p1 }
  0x10   : > { %s52_s23 = ssub.s32 %s880_s16, %s1151_s20  ;;  %p158_p6 = scmp.eq.s32.totalorder %s943_s18, 3 }
  0x11   : > { %p57_p7 = scmp.eq.s32.totalorder %s52_s23, 0  ;;  %p963_p8 = por %p73_p5, %p72_p3 }
  0x12   : > { %p967_p9 = por %p158_p6, %p66_p1  ;;  %p164_p10 = scmp.eq.s32.totalorder %s586_s19, 3 }
  0x13   : > { %s972_s26 = scalar_select %p57_p7, %s872_s14, %s59_s21  }
  0x14   : > { %p974_p11 = por %p164_p10, %p72_p3  ;;  %p664_p12 = scmp.lt.s32.totalorder %s884_s17, 4 }
  0x15   : > { %1138 = sst [smem:[#allocation14_spill]] %s972_s26  ;;  %s980_s28 = sand.u32 1, %s872_s14  }
  0x16   : > { %s207_s29 = sand.u32 1, %s884_s17   ;;  %s592_s30 = sshll.u32 %s980_s28, 8 }
  0x17   : > { %p986_p13 = pnand %p664_p12, %p955_p4  ;;  %s606_s5 = sshll.u32 %s880_s16, 12 }
  0x18   : > { %s1141_s1 = sld [smem:[#allocation15_spill]]  ;;  %s211_s9 = scalar_lea.vmem [#allocation6], %s592_s30 }
  0x19   : > { %s221_s10 = sshll.u32 %s211_s9, 4  ;;  %s994_s11 = scalar_lea.sflag [#allocation7], %s207_s29  ;;  %s222_s10 = int_to_ptr.vmem [resolvable:$true] %s221_s10 }
  0x1a   : > { %p718_p0 = pneg %p986_p13  ;;  %s729_s19 = scalar_lea.vmem %s222_s10, 4096 }
  0x1b   : > { %p730_p1 = scmp.ne.s32.totalorder %s222_s10, %s729_s19  ;;  %s886_s21 = smov [#allocation6]  }
  0x1c   : > { %s734_s22 = sshll.u32 %s886_s21, 4  ;;  %s735_s22 = int_to_ptr.vmem [resolvable:$false] %s734_s22 }
  0x1d   : > { %p732_p2 = pnand %p730_p1, %p718_p0  ;;  %s736_s23 = scalar_lea.vmem %s735_s22, 8192 }
  0x1e   : > { %s220_s8 = scalar_lea.hbm %s1141_s1, %s606_s5  ;;  %p737_p4 = scmp.lt.s32.totalorder %s222_s10, %s735_s22 }
  0x1f   : > { %p733_p3 = pneg %p732_p2  ;;  %p738_p5 = scmp.lt.s32.totalorder %s736_s23, %s729_s19 }
  0x21   : > { %p739_p6 = por %p738_p5, %p737_p4 }
  0x23   : > { %p740_p7 = pnand %p739_p6, %p733_p3 }
  0x25   : > { %743 = shalt.err (!%p740_p7)
}
  0x26   : > { %s887_s30 = smov 128   ;;  %s888_s29 = smov 8  }
  0x27   : > { %656 = dma.hbm_to_vmem [thread:$0]  (!%p986_p13), %s220_s8, 4096, %s222_s10, %s994_s11, %s887_s30, %s887_s30, %s888_s29  }
  0x28   : > { %p596_p10 = scmp.ge.s32.totalorder %s884_s17, 1  ;;  %p247_p12 = scmp.lt.s32.totalorder %s884_s17, 5 }
  0x29   : > { %s589_s6 = sshll.u32 %s980_s28, 4  ;;  %s605_s7 = sshll.u32 %s880_s16, 8 }
  0x2a   : > { %p1006_p1 = pnand %p596_p10, %p247_p12  ;;  %s198_s21 = scalar_lea.hbm %s1128_s0, %s605_s7 }
  0x2b   : > { %s188_s22 = scalar_lea.vmem [#allocation3], %s589_s6  ;;  %s595_s1 = sshll.u32 %s880_s16, 4 }
  0x2c   : > { %s200_s23 = sshll.u32 %s188_s22, 4  ;;  %s185_s20 = scalar_lea.sflag [#allocation4], %s980_s28  ;;  %s201_s23 = int_to_ptr.vmem [resolvable:$true] %s200_s23 }
  0x2d   : > { %s757_s26 = scalar_lea.vmem %s201_s23, 256  ;;  %s889_s8 = smov [#allocation3]  }
  0x2e   : > { %p758_p2 = scmp.ne.s32.totalorder %s201_s23, %s757_s26  ;;  %s762_s10 = sshll.u32 %s889_s8, 4  ;;  %s763_s10 = int_to_ptr.vmem [resolvable:$false] %s762_s10 }
  0x2f   : > { %s764_s30 = scalar_lea.vmem %s763_s10, 512  ;;  %p765_p5 = scmp.lt.s32.totalorder %s201_s23, %s763_s10 }
  0x30   : > { %p760_p3 = pnand %p758_p2, %p718_p0  ;;  %p766_p6 = scmp.lt.s32.totalorder %s764_s30, %s757_s26 }
  0x32   : > { %p761_p4 = pneg %p760_p3  ;;  %p767_p7 = por %p766_p6, %p765_p5 }
  0x34   : > { %p768_p10 = pnand %p767_p7, %p761_p4 }
  0x36   : > { %771 = shalt.err (!%p768_p10)
}
  0x37   : > { %653 = dma.hbm_to_vmem [thread:$0]  (!%p986_p13), %s198_s21, 256, %s201_s23, %s185_s20  }
  0x38   : > { %s240_s7 = scalar_lea.hbm %s1130_s2, %s595_s1  ;;  %s234_s9 = scalar_lea.vmem [#allocation8], %s980_s28 }
  0x39   : > { %s242_s19 = sshll.u32 %s234_s9, 4  ;;  %s890_s26 = smov [#allocation8]   ;;  %s243_s19 = int_to_ptr.vmem [resolvable:$true] %s242_s19 }
  0x3a   : > { %s785_s22 = scalar_lea.vmem %s243_s19, 16  ;;  %s790_s8 = sshll.u32 %s890_s26, 4  ;;  %s791_s8 = int_to_ptr.vmem [resolvable:$false] %s790_s8 }
  0x3b   : > { %p786_p12 = scmp.ne.s32.totalorder %s243_s19, %s785_s22  ;;  %s792_s10 = scalar_lea.vmem %s791_s8, 32 }
  0x3c   : > { %p793_p4 = scmp.lt.s32.totalorder %s243_s19, %s791_s8  ;;  %p794_p5 = scmp.lt.s32.totalorder %s792_s10, %s785_s22 }
  0x3d   : > { %p788_p2 = pnand %p786_p12, %p718_p0 }
  0x3e   : > { %p795_p6 = por %p794_p5, %p793_p4 }
  0x3f   : > { %p789_p3 = pneg %p788_p2 }
  0x41   : > { %p796_p7 = pnand %p795_p6, %p789_p3 }
  0x43   : > { %799 = shalt.err (!%p796_p7)
}
  0x44   : > { %659 = dma.hbm_to_vmem [thread:$0]  (!%p986_p13), %s240_s7, 16, %s243_s19, %s994_s11  }
  0x45   : > { %251 = sbr.rel (%p1006_p1) target bundleno = 323 (0x143), region = 32  ;;  %s1035_s1 = sand.u32 (!%p1006_p1), 1, %s868_s13  }
  0x46   : > { %s597_s20 = sshll.u32 (!%p1006_p1), %s1035_s1, 4  ;;  %s254_s28 = scalar_lea.sflag (!%p1006_p1), [#allocation4], %s1035_s1 }
  0x47   : > { %s1039_s21 = scalar_lea.vmem (!%p1006_p1), [#allocation3], %s597_s20 }
  0x4a   : > { %851 = dma.done.wait (%p963_p8), %s254_s28, 256  }
  0x4b   : > { %853 = vsyncadd (%p963_p8), %s254_s28, 4294967040  ;;  %s262_s4 = sand.u32 1, %s943_s18   ;;  %s598_s11 = sshll.u32 %s1035_s1, 8 }
  0x4c   : > { %s263_s5 = scalar_lea.sflag [#allocation7], %s262_s4  ;;  %s1047_s23 = scalar_lea.vmem [#allocation6], %s598_s11 }
  0x4d   : > { %855 = dma.done.wait (%p963_p8), %s263_s5, 4112  }
  0x4e   : > { %857 = vsyncadd (%p963_p8), %s263_s5, 4294963184  ;;  %v347_v0 = vld [vmem:[%s1047_s23 + $0xf8] sm:$0xff]  ;;  %v346_v2 = vld [vmem:[%s1047_s23 + $0xf0] sm:$0xff]  ;;  %s599_s18 = sshll.u32 %s1035_s1, 3  ;;  %s274_s24 = scalar_lea.vmem [#allocation8], %s1035_s1 }
  0x4f   : > { %v331_v1 = vld [vmem:[%s1047_s23 + $0x78] sm:$0xff]  ;;  %607 = vmatprep.subr.mxu0 %v347_v0  ;;  %v330_v3 = vld [vmem:[%s1047_s23 + $0x70] sm:$0xff]  ;;  %v345_v4 = vld [vmem:[%s1047_s23 + $0xe8] sm:$0xff]  ;;  %s602_s30 = sshll.u32 %s876_s15, 7  ;;  %s305_s29 = scalar_lea.vmem [#allocation9], %s599_s18 }
  0x50   : > { %608 = vmatpush3.msra.mxu0 %v331_v1  ;;  %v329_v5 = vld [vmem:[%s1047_s23 + $0x68] sm:$0xff]  ;;  %v344_v6 = vld [vmem:[%s1047_s23 + $0xe0] sm:$0xff]  ;;  %v343_v8 = vld [vmem:[%s1047_s23 + $0xd8] sm:$0xff]  ;;  %s449_s6 = sshll.u32 %s305_s29, 4  ;;  %s447_s19 = scalar_lea.hbm %s1131_s3, %s602_s30  ;;  %s450_s6 = int_to_ptr.vmem [resolvable:$true] %s449_s6 }
  0x51   : > { %609 = vmatprep.subr.mxu0 %v346_v2  ;;  %v328_v7 = vld [vmem:[%s1047_s23 + $0x60] sm:$0xff]  ;;  %v327_v9 = vld [vmem:[%s1047_s23 + $0x58] sm:$0xff]  ;;  %v342_v10 = vld [vmem:[%s1047_s23 + $0xd0] sm:$0xff]  ;;  %s434_s22 = scalar_lea.sflag [#allocation5], %s1035_s1  ;;  %s800_s26 = scalar_lea.vmem %s450_s6, 128 }
  0x52   : > { %610 = vmatpush3.msra.mxu0 %v330_v3  ;;  %v326_v11 = vld [vmem:[%s1047_s23 + $0x50] sm:$0xff]  ;;  %v341_v12 = vld [vmem:[%s1047_s23 + $0xc8] sm:$0xff]  ;;  %v340_v15 = vld [vmem:[%s1047_s23 + $0xc0] sm:$0xff]  ;;  %p801_p8 = scmp.ne.s32.totalorder %s450_s6, %s800_s26  ;;  %s891_s8 = smov [#allocation9]  }
  0x53   : > { %611 = vmatprep.subr.mxu0 %v345_v4  ;;  %v315_v13 = vld [vmem:[%s1039_s21 + $0x8] sm:$0xff]  ;;  %v324_v16 = vld [vmem:[%s1047_s23 + $0x40] sm:$0xff]  ;;  %v338_v19 = vld [vmem:[%s1047_s23 + $0xb0] sm:$0xff]  ;;  %s804_s10 = sshll.u32 %s891_s8, 4  ;;  %s805_s10 = int_to_ptr.vmem [resolvable:$false] %s804_s10 }
  0x54   : > { %612 = vmatpush3.msra.mxu0 %v329_v5  ;;  %v325_v14 = vld [vmem:[%s1047_s23 + $0x48] sm:$0xff]  ;;  %412 = vmatprep.mubr.f32.mxu0 %v315_v13  ;;  %v339_v17 = vld [vmem:[%s1047_s23 + $0xb8] sm:$0xff]  ;;  %v322_v20 = vld [vmem:[%s1047_s23 + $0x30] sm:$0xff]  ;;  %p802_p13 = pnand %p801_p8, %p967_p9  ;;  %s806_s15 = scalar_lea.vmem %s805_s10, 256 }
  0x55   : > { %613 = vmatprep.subr.mxu0 %v344_v6  ;;  %v323_v18 = vld [vmem:[%s1047_s23 + $0x38] sm:$0xff]  ;;  %v337_v21 = vld [vmem:[%s1047_s23 + $0xa8] sm:$0xff]  ;;  %v336_v23 = vld [vmem:[%s1047_s23 + $0xa0] sm:$0xff]  ;;  %p807_p1 = scmp.lt.s32.totalorder %s450_s6, %s805_s10  ;;  %p808_p10 = scmp.lt.s32.totalorder %s806_s15, %s800_s26 }
  0x56   : > { %614 = vmatpush3.msra.mxu0 %v328_v7  ;;  %v321_v22 = vld [vmem:[%s1047_s23 + $0x28] sm:$0xff]  ;;  %v320_v24 = vld [vmem:[%s1047_s23 + $0x20] sm:$0xff]  ;;  %v335_v25 = vld [vmem:[%s1047_s23 + $0x98] sm:$0xff]  ;;  %p803_p0 = pneg %p802_p13 }
  0x57   : > { %615 = vmatprep.subr.mxu0 %v343_v8  ;;  %v319_v26 = vld [vmem:[%s1047_s23 + $0x18] sm:$0xff]  ;;  %v334_v27 = vld [vmem:[%s1047_s23 + $0x90] sm:$0xff]  ;;  %v333_v29 = vld [vmem:[%s1047_s23 + $0x88] sm:$0xff]  ;;  %p809_p12 = por %p808_p10, %p807_p1 }
  0x58   : > { %616 = vmatpush3.msra.mxu0 %v327_v9  ;;  %v318_v28 = vld [vmem:[%s1047_s23 + $0x10] sm:$0xff]  ;;  %v317_v30 = vld [vmem:[%s1047_s23 + $0x8] sm:$0xff]  ;;  %v332_v31 = vld [vmem:[%s1047_s23 + $0x80] sm:$0xff] }
  0x59   : > { %617 = vmatprep.subr.mxu0 %v342_v10  ;;  %v316_v32 = vld [vmem:[%s1047_s23] sm:$0xff]  ;;  %p810_p2 = pnand %p809_p12, %p803_p0 }
  0x5a   : > { %618 = vmatpush3.msra.mxu0 %v326_v11  ;;  %v314_v33 = vld [vmem:[%s1039_s21] sm:$0xff] }
  0x5b   : > { %619 = vmatprep.subr.mxu0 %v341_v12  ;;  %v600_v36 = vld [vmem:[%s274_s24] ss:$0 sm:$0xff] }
  0x5c   : > { %620 = vmatpush3.msra.mxu0 %v325_v14 }
  0x5d   : > { %621 = vmatprep.subr.mxu0 %v340_v15 }
  0x5e   : > { %622 = vmatpush3.msra.mxu0 %v324_v16 }
  0x5f   : > { %623 = vmatprep.subr.mxu0 %v339_v17 }
  0x60   : > { %624 = vmatpush3.msra.mxu0 %v323_v18 }
  0x61   : > { %625 = vmatprep.subr.mxu0 %v338_v19 }
  0x62   : > { %626 = vmatpush3.msra.mxu0 %v322_v20 }
  0x63   : > { %627 = vmatprep.subr.mxu0 %v337_v21 }
  0x64   : > { %628 = vmatpush3.msra.mxu0 %v321_v22 }
  0x65   : > { %629 = vmatprep.subr.mxu0 %v336_v23 }
  0x66   : > { %630 = vmatpush3.msra.mxu0 %v320_v24 }
  0x67   : > { %631 = vmatprep.subr.mxu0 %v335_v25 }
  0x68   : > { %632 = vmatpush3.msra.mxu0 %v319_v26 }
  0x69   : > { %633 = vmatprep.subr.mxu0 %v334_v27 }
  0x6a   : > { %634 = vmatpush3.msra.mxu0 %v318_v28 }
  0x6b   : > { %635 = vmatprep.subr.mxu0 %v333_v29 }
  0x6c   : > { %636 = vmatpush3.msra.mxu0 %v317_v30 }
  0x6d   : > { %637 = vmatprep.subr.mxu0 %v332_v31 }
  0x6e   : > { %638 = vmatpush3.msra.mxu0 %v316_v32 }
  0x6f   : > { %413 = vmatmul.mubr.f32.vlgmr.msra.gmra.mxu0 %v314_v33 }
 0x12f   : > { %v639_v34 = vpop.f32.mrf.mxu0 }
 0x131   : > { %v640_v35 = vpop.f32.mrf.mxu0 }
 0x132   : > { %v641_v37 = vadd.f32 %v640_v35, %v639_v34 }
 0x134   : > { %v431_v38 = vadd.f32 %v641_v37, %v600_v36 }
 0x136   : > { %432 = vst [vmem:[%s305_s29] sm:$0xff] %v431_v38 }
 0x137   : > { %813 = shalt.err (!%p810_p2)
}
 0x138   : > { %s814_s20 = scalar_lea.hbm %s447_s19, 128  ;;  %s818_s21 = scalar_lea.hbm %s1131_s3, 512 }
 0x139   : > { %p815_p3 = scmp.ne.s32.totalorder %s447_s19, %s814_s20  ;;  %p819_p6 = scmp.lt.s32.totalorder %s447_s19, %s1131_s3 }
 0x13a   : > { %p820_p7 = scmp.lt.s32.totalorder %s818_s21, %s814_s20 }
 0x13b   : > { %p816_p4 = pnand %p815_p3, %p967_p9 }
 0x13c   : > { %p821_p8 = por %p820_p7, %p819_p6 }
 0x13d   : > { %p817_p5 = pneg %p816_p4 }
 0x13f   : > { %p822_p13 = pnand %p821_p8, %p817_p5 }
 0x141   : > { %825 = shalt.err (!%p822_p13)
}
 0x142   : > { %648 = dma.vmem_to_hbm [thread:$0]  (%p967_p9), %s450_s6, 128, %s447_s19, %s434_s22  }
 0x143 PF: > { %p665_p0 = scmp.ge.s32.totalorder %s884_s17, 2  ;;  %s461_s5 = sand.u32 1, %s864_s12  }
 0x144   : > { %s462_s23 = scalar_lea.sflag [#allocation5], %s461_s5 }
 0x145   : > { %p661_p1 = pnand %p665_p0, %p974_p11 }
 0x147   : > { %p662_p10 = pneg %p661_p1 }
 0x149   : > { %859 = dma.done.wait (%p662_p10), %s462_s23, 128  }
 0x14a   : > { %861 = vsyncadd (%p662_p10), %s462_s23, 4294967168  ;;  %s22_s17 = sadd.s32 1, %s884_s17   ;;  %s1143_s18 = sld [smem:[#allocation14_spill]] }
 0x14b   : > { %p19_p12 = scmp.ge.s32.totalorder %s22_s17, 6   ;;  %s1144_s25 = sld [smem:[#allocation13_spill]] }
 0x14c   : > { %s1145_s12 = smov %s868_s13  ;;  %s1146_s13 = smov %s872_s14 }
 0x14d   : > { %s1148_s15 = smov %s880_s16  ;;  %21 = sbr.rel (!%p19_p12) target bundleno = 10 (0xa), region = 109 }
 0x150   : > { %s1147_s14 = smov %s1143_s18 }
 0x151   : > { %s1149_s16 = smov %s1144_s25 }
 0x152   :  { %467 = vsyncpa [#allocation4], 1 }
 0x153   :  { %469 = vsyncpa [#allocation4 + $0x1], 1 }
 0x154   :  { %470 = vsyncpa [#allocation7], 1 }
 0x155   :  { %472 = vsyncpa [#allocation7 + $0x1], 1 }
 0x156   :  { %473 = vsyncpa [#allocation5], 1 }
 0x157   :  { %475 = vsyncpa [#allocation5 + $0x1], 1 }

</bundles_post_ra>
